<compile_context>
chip_gen: v6e
topology: v6e:2x2x1
jax: 0.10.0
libtpu: 0.0.40
codegen_flags: <defaults>
</compile_context>

<pallas_src>
import functools

import jax
import jax.numpy as jnp
from jax.experimental import pallas as pl
from jax.experimental.pallas import tpu as pltpu

# ----------------------------- model config ---------------------------------
LATENT_FEATURES = 5     # latent_features
LAYERS_FACTOR = 8       # layers_factor -> coder_layers reversed = [8, 16, 32]
OUT_FEATURES = 16       # out_features
BATCH = 8               # batch size for the example run

N_LAYERS = 4            # Linear x4 (ReLU, ReLU, ReLU, Tanh)
LANE = 128              # TPU lane width
SUBLANE = 8             # TPU sublane width


def _round_up(n, m):
    return ((n + m - 1) // m) * m


# ------------------------------- kernel --------------------------------------
def old_decoder_kernel(x_ref, w_ref, b_ref, o_ref):
    """Fused 4-layer MLP on one (TB, P) batch tile.

    x_ref: (TB, P)           padded input tile
    w_ref: (N_LAYERS, P, P)  zero-padded weights, (in, out) layout
    b_ref: (N_LAYERS, 1, P)  zero-padded biases
    o_ref: (TB, P)           padded output tile
    """
    h = x_ref[...]
    # Three hidden layers: Linear + ReLU (statically unrolled at trace time).
    for k in range(N_LAYERS - 1):
        h = jnp.maximum(
            jnp.dot(h, w_ref[k], preferred_element_type=jnp.float32) + b_ref[k],
            0.0,
        )
    # Output layer: Linear + Tanh (tanh runs on the EUP, off the VALU path).
    o_ref[...] = jnp.tanh(
        jnp.dot(h, w_ref[N_LAYERS - 1], preferred_element_type=jnp.float32)
        + b_ref[N_LAYERS - 1]
    )


# --------------------------- parameter packing --------------------------------
def pack_params(weights, biases):
    """Pack per-layer (in,out) weights and (out,) biases into two stacked,
    zero-padded float32 arrays.  Call once at model-setup time."""
    dims = [weights[0].shape[0]] + [w.shape[1] for w in weights]
    P = _round_up(max(dims), LANE)

    w_stack = jnp.zeros((N_LAYERS, P, P), jnp.float32)
    b_stack = jnp.zeros((N_LAYERS, 1, P), jnp.float32)
    for k, (w, b) in enumerate(zip(weights, biases)):
        w_stack = w_stack.at[k, : w.shape[0], : w.shape[1]].set(
            w.astype(jnp.float32)
        )
        b_stack = b_stack.at[k, 0, : b.shape[0]].set(b.astype(jnp.float32))
    return w_stack, b_stack


# ------------------------------ wrapper ---------------------------------------
@functools.partial(jax.jit, static_argnames=("out_features",))
def old_decoder_forward(x, w_stack, b_stack, *, out_features):
    """Equivalent of OldDecoder.forward(x): x (B, latent) -> (B, out_features)."""
    B, f_in = x.shape
    P = w_stack.shape[-1]

    # Pad the batch to a multiple of the sublane width; tile at up to 128 rows.
    B_pad = _round_up(max(B, SUBLANE), SUBLANE)
    TB = min(LANE, B_pad)
    B_pad = _round_up(B_pad, TB)

    x_pad = jnp.pad(
        x.astype(jnp.float32), ((0, B_pad - B), (0, P - f_in))
    )

    out_pad = pl.pallas_call(
        old_decoder_kernel,
        out_shape=jax.ShapeDtypeStruct((B_pad, P), jnp.float32),
        grid=(B_pad // TB,),
        in_specs=[
            pl.BlockSpec((TB, P), lambda i: (i, 0)),
            pl.BlockSpec((N_LAYERS, P, P), lambda i: (0, 0, 0)),
            pl.BlockSpec((N_LAYERS, 1, P), lambda i: (0, 0, 0)),
        ],
        out_specs=pl.BlockSpec((TB, P), lambda i: (i, 0)),
        compiler_params=pltpu.CompilerParams(
            dimension_semantics=("parallel",)
        ),
    )(x_pad, w_stack, b_stack)

    return out_pad[:B, :out_features]


# --------------------------- reference & init ---------------------------------
def old_decoder_reference(x, weights, biases):
    """Pure-JAX reference of OldDecoder.forward (float32)."""
    h = x.astype(jnp.float32)
    for k, (w, b) in enumerate(zip(weights, biases)):
        h = jnp.dot(h, w) + b
        h = jnp.maximum(h, 0.0) if k < len(weights) - 1 else jnp.tanh(h)
    return h


def _init_linear(key, fan_in, fan_out):
    """PyTorch default init: U(-1/sqrt(fan_in), 1/sqrt(fan_in)) for W and b."""
    kw, kb = jax.random.split(key)
    bound = 1.0 / float(fan_in) ** 0.5
    w = jax.random.uniform(kw, (fan_in, fan_out), jnp.float32, -bound, bound)
    b = jax.random.uniform(kb, (fan_out,), jnp.float32, -bound, bound)
    return w, b


def init_params(key):
    # coder_layers = [4*lf, 2*lf, 1*lf] reversed -> [8, 16, 32]
    coder_layers = [1 * LAYERS_FACTOR, 2 * LAYERS_FACTOR, 4 * LAYERS_FACTOR]
    dims = [LATENT_FEATURES] + coder_layers + [OUT_FEATURES]
    keys = jax.random.split(key, N_LAYERS)
    weights, biases = [], []
    for k in range(N_LAYERS):
        w, b = _init_linear(keys[k], dims[k], dims[k + 1])
        weights.append(w)
        biases.append(b)
    return tuple(weights), tuple(biases)


# -------------------------------- main ----------------------------------------
if __name__ == "__main__":
    key = jax.random.PRNGKey(0)
    k_param, k_x = jax.random.split(key)

    weights, biases = init_params(k_param)
    x = jax.random.normal(k_x, (BATCH, LATENT_FEATURES), jnp.float32)

    # One-time packing (off the hot path).
    w_stack, b_stack = pack_params(weights, biases)
    w_stack, b_stack = jax.block_until_ready((w_stack, b_stack))

    out = old_decoder_forward(x, w_stack, b_stack, out_features=OUT_FEATURES)
    out = jax.block_until_ready(out)

    assert out.shape == (BATCH, OUT_FEATURES), out.shape
    assert jnp.all(jnp.isfinite(out))

    ref = old_decoder_reference(x, weights, biases)
    assert jnp.allclose(out, ref, rtol=1e-5, atol=1e-5), (
        float(jnp.max(jnp.abs(out - ref)))
    )

    print("KERNEL_OK")
</pallas_src>

<mosaic_0001>
module attributes {stable_mosaic.version = 11 : i64} {
  func.func @old_decoder_kernel(%arg0: i32, %arg1: memref<8x128xf32, #tpu.memory_space<vmem>>, %arg2: memref<4x128x128xf32, #tpu.memory_space<vmem>>, %arg3: memref<4x1x128xf32, #tpu.memory_space<vmem>>, %arg4: memref<8x128xf32, #tpu.memory_space<vmem>>) attributes {dimension_semantics = [#tpu.dimension_semantics<parallel>], iteration_bounds = array<i64: 1>, scalar_prefetch = 0 : i64, scratch_operands = 0 : i64, tpu.core_type = #tpu.core_type<tc>, window_params = [{transform_indices = @transform_0, window_bounds = array<i64: 8, 128>}, {pipeline_mode = #tpu.pipeline_mode<synchronous>, transform_indices = @transform_1, window_bounds = array<i64: 4, 128, 128>}, {pipeline_mode = #tpu.pipeline_mode<synchronous>, transform_indices = @transform_2, window_bounds = array<i64: 4, 1, 128>}, {transform_indices = @transform_3, window_bounds = array<i64: 8, 128>}]} {
    %c0 = arith.constant 0 : index
    %c0_0 = arith.constant 0 : index
    %0 = vector.load %arg1[%c0, %c0_0] : memref<8x128xf32, #tpu.memory_space<vmem>>, vector<8x128xf32>
    %c0_1 = arith.constant 0 : index
    %c0_2 = arith.constant 0 : index
    %c0_3 = arith.constant 0 : index
    %1 = vector.load %arg2[%c0_1, %c0_2, %c0_3] : memref<4x128x128xf32, #tpu.memory_space<vmem>>, vector<1x128x128xf32>
    %2 = vector.shape_cast %1 : vector<1x128x128xf32> to vector<128x128xf32>
    %cst = arith.constant dense<0.000000e+00> : vector<8x128xf32>
    %3 = tpu.matmul %0, %2, %cst {dimension_numbers = #tpu.dot_dimension_numbers<[1], [0], [0], [1], [0, 0, 1, 1], [], []>} : vector<8x128xf32>, vector<128x128xf32>, vector<8x128xf32> -> vector<8x128xf32>
    %c0_4 = arith.constant 0 : index
    %c0_5 = arith.constant 0 : index
    %c0_6 = arith.constant 0 : index
    %4 = vector.load %arg3[%c0_4, %c0_5, %c0_6] : memref<4x1x128xf32, #tpu.memory_space<vmem>>, vector<1x1x128xf32>
    %5 = vector.shape_cast %4 : vector<1x1x128xf32> to vector<1x128xf32>
    %6 = vector.broadcast %5 : vector<1x128xf32> to vector<8x128xf32>
    %7 = arith.addf %3, %6 : vector<8x128xf32>
    %cst_7 = arith.constant 0.000000e+00 : f32
    %8 = vector.broadcast %cst_7 : f32 to vector<8x128xf32>
    %9 = arith.maximumf %7, %8 : vector<8x128xf32>
    %c1 = arith.constant 1 : index
    %c0_8 = arith.constant 0 : index
    %c0_9 = arith.constant 0 : index
    %10 = vector.load %arg2[%c1, %c0_8, %c0_9] : memref<4x128x128xf32, #tpu.memory_space<vmem>>, vector<1x128x128xf32>
    %11 = vector.shape_cast %10 : vector<1x128x128xf32> to vector<128x128xf32>
    %cst_10 = arith.constant dense<0.000000e+00> : vector<8x128xf32>
    %12 = tpu.matmul %9, %11, %cst_10 {dimension_numbers = #tpu.dot_dimension_numbers<[1], [0], [0], [1], [0, 0, 1, 1], [], []>} : vector<8x128xf32>, vector<128x128xf32>, vector<8x128xf32> -> vector<8x128xf32>
    %c1_11 = arith.constant 1 : index
    %c0_12 = arith.constant 0 : index
    %c0_13 = arith.constant 0 : index
    %13 = vector.load %arg3[%c1_11, %c0_12, %c0_13] : memref<4x1x128xf32, #tpu.memory_space<vmem>>, vector<1x1x128xf32>
    %14 = vector.shape_cast %13 : vector<1x1x128xf32> to vector<1x128xf32>
    %15 = vector.broadcast %14 : vector<1x128xf32> to vector<8x128xf32>
    %16 = arith.addf %12, %15 : vector<8x128xf32>
    %cst_14 = arith.constant 0.000000e+00 : f32
    %17 = vector.broadcast %cst_14 : f32 to vector<8x128xf32>
    %18 = arith.maximumf %16, %17 : vector<8x128xf32>
    %c2 = arith.constant 2 : index
    %c0_15 = arith.constant 0 : index
    %c0_16 = arith.constant 0 : index
    %19 = vector.load %arg2[%c2, %c0_15, %c0_16] : memref<4x128x128xf32, #tpu.memory_space<vmem>>, vector<1x128x128xf32>
    %20 = vector.shape_cast %19 : vector<1x128x128xf32> to vector<128x128xf32>
    %cst_17 = arith.constant dense<0.000000e+00> : vector<8x128xf32>
    %21 = tpu.matmul %18, %20, %cst_17 {dimension_numbers = #tpu.dot_dimension_numbers<[1], [0], [0], [1], [0, 0, 1, 1], [], []>} : vector<8x128xf32>, vector<128x128xf32>, vector<8x128xf32> -> vector<8x128xf32>
    %c2_18 = arith.constant 2 : index
    %c0_19 = arith.constant 0 : index
    %c0_20 = arith.constant 0 : index
    %22 = vector.load %arg3[%c2_18, %c0_19, %c0_20] : memref<4x1x128xf32, #tpu.memory_space<vmem>>, vector<1x1x128xf32>
    %23 = vector.shape_cast %22 : vector<1x1x128xf32> to vector<1x128xf32>
    %24 = vector.broadcast %23 : vector<1x128xf32> to vector<8x128xf32>
    %25 = arith.addf %21, %24 : vector<8x128xf32>
    %cst_21 = arith.constant 0.000000e+00 : f32
    %26 = vector.broadcast %cst_21 : f32 to vector<8x128xf32>
    %27 = arith.maximumf %25, %26 : vector<8x128xf32>
    %c3 = arith.constant 3 : index
    %c0_22 = arith.constant 0 : index
    %c0_23 = arith.constant 0 : index
    %28 = vector.load %arg2[%c3, %c0_22, %c0_23] : memref<4x128x128xf32, #tpu.memory_space<vmem>>, vector<1x128x128xf32>
    %29 = vector.shape_cast %28 : vector<1x128x128xf32> to vector<128x128xf32>
    %cst_24 = arith.constant dense<0.000000e+00> : vector<8x128xf32>
    %30 = tpu.matmul %27, %29, %cst_24 {dimension_numbers = #tpu.dot_dimension_numbers<[1], [0], [0], [1], [0, 0, 1, 1], [], []>} : vector<8x128xf32>, vector<128x128xf32>, vector<8x128xf32> -> vector<8x128xf32>
    %c3_25 = arith.constant 3 : index
    %c0_26 = arith.constant 0 : index
    %c0_27 = arith.constant 0 : index
    %31 = vector.load %arg3[%c3_25, %c0_26, %c0_27] : memref<4x1x128xf32, #tpu.memory_space<vmem>>, vector<1x1x128xf32>
    %32 = vector.shape_cast %31 : vector<1x1x128xf32> to vector<1x128xf32>
    %33 = vector.broadcast %32 : vector<1x128xf32> to vector<8x128xf32>
    %34 = arith.addf %30, %33 : vector<8x128xf32>
    %35 = math.tanh %34 : vector<8x128xf32>
    %c0_28 = arith.constant 0 : index
    %c0_29 = arith.constant 0 : index
    %36 = vector.load %arg4[%c0_28, %c0_29] : memref<8x128xf32, #tpu.memory_space<vmem>>, vector<8x128xf32>
    tpu.vector_store %arg4[%c0_28, %c0_29], %35 {strides = array<i32>} : memref<8x128xf32, #tpu.memory_space<vmem>>, vector<8x128xf32>,
    return
  }
  func.func @transform_0(%arg0: i32) -> (i32, i32) {
    %c0_i32 = arith.constant 0 : i32
    %c0_i32_0 = arith.constant 0 : i32
    return %arg0, %c0_i32 : i32, i32
  }
  func.func @transform_1(%arg0: i32) -> (i32, i32, i32) {
    %c0_i32 = arith.constant 0 : i32
    %c0_i32_0 = arith.constant 0 : i32
    %c0_i32_1 = arith.constant 0 : i32
    %c0_i32_2 = arith.constant 0 : i32
    return %c0_i32, %c0_i32_0, %c0_i32_1 : i32, i32, i32
  }
  func.func @transform_2(%arg0: i32) -> (i32, i32, i32) {
    %c0_i32 = arith.constant 0 : i32
    %c0_i32_0 = arith.constant 0 : i32
    %c0_i32_1 = arith.constant 0 : i32
    %c0_i32_2 = arith.constant 0 : i32
    return %c0_i32, %c0_i32_0, %c0_i32_1 : i32, i32, i32
  }
  func.func @transform_3(%arg0: i32) -> (i32, i32) {
    %c0_i32 = arith.constant 0 : i32
    %c0_i32_0 = arith.constant 0 : i32
    return %arg0, %c0_i32 : i32, i32
  }
}

</mosaic_0001>

<bundles_post_ra>
// kernel: old_decoder_forward.1
= control target key start
LH: loop header
LB: loop body
LE: loop exit
PB: predicated region body
PF: predicated region fallthrough
CT: control target
= control target key end

     0   :  { %8 = vsyncpa [#allocation3], 0  ;;  %s814_s0 = inlined_call_operand.vmem [shape: f32[8,128], index: 0, kind: input, shape index: {}]   ;;  %s815_s1 = inlined_call_operand.hbm [shape: f32[4,128,128], index: 1, kind: input, shape index: {}]   ;;  %s816_s2 = inlined_call_operand.vmem [shape: f32[4,1,128], index: 2, kind: input, shape index: {}]   ;;  %s817_s3 = inlined_call_operand.hbm [shape: f32[8,128], index: 3, kind: output, shape index: {}]  }
   0x1   :  { %9 = vsyncpa [#allocation4], 0  ;;  %s695_s12 = smov [#allocation2]  }
   0x2   :  { %s17_s13 = sshll.u32 %s695_s12, 4  ;;  %s18_s13 = int_to_ptr.vmem [resolvable:$true] %s17_s13 }
   0x3   :  { %s659_s14 = scalar_lea.vmem %s18_s13, 8192  ;;  %p664_p1 = scmp.lt.s32.totalorder %s18_s13, %s18_s13 }
   0x4   :  { %p660_p0 = scmp.ne.s32.totalorder %s18_s13, %s659_s14  ;;  %p665_p2 = scmp.lt.s32.totalorder %s659_s14, %s659_s14 }
   0x6   :  { %p666_p3 = por %p665_p2, %p664_p1 }
   0x8   :  { %p667_p4 = pnand %p666_p3, %p660_p0 }
   0xa   :  { %670 = shalt.err (!%p667_p4)
}
   0xb   :  { %s696_s15 = smov 128   ;;  %s697_s16 = smov 8  }
   0xc   :  { %23 = dma.hbm_to_vmem [thread:$0]  %s815_s1, 8192, %s18_s13, [#allocation3], %s696_s15, %s696_s15, %s697_s16  }
   0xd   :  { %691 = dma.done.wait [#allocation3], 8192  }
   0xe   :  { %692 = vsyncadd [#allocation3], 4294959104  ;;  %v698_v0 = vmov 0.0   ;;  %vm699_vm0 = vmmov 0   ;;  %v45_v1 = vld [vmem:[#allocation2 + $0x78] sm:$0xff]  ;;  %v44_v2 = vld [vmem:[#allocation2 + $0x70] sm:$0xff] }
   0xf   :  { %503 = vmatprep.subr.mxu0 %v698_v0  ;;  %535 = vmatprep.mubr.msk.f32.mxu0 %vm699_vm0, %v698_v0  ;;  %v43_v3 = vld [vmem:[#allocation2 + $0x68] sm:$0xff]  ;;  %v42_v4 = vld [vmem:[#allocation2 + $0x60] sm:$0xff]  ;;  %v140_v5 = vld [vmem:[#allocation2 + $0xf8] sm:$0xff]  ;;  %s700_s27 = smov [#allocation5]  }
  0x10   :  { %538 = vmatprep.subr.mxu1 %v698_v0  ;;  %570 = vmatprep.mubr.msk.f32.mxu1 %vm699_vm0, %v698_v0  ;;  %v41_v6 = vld [vmem:[#allocation2 + $0x58] sm:$0xff]  ;;  %v139_v7 = vld [vmem:[#allocation2 + $0xf0] sm:$0xff]  ;;  %v138_v8 = vld [vmem:[#allocation2 + $0xe8] sm:$0xff]  ;;  %s419_s28 = sshll.u32 %s700_s27, 4  ;;  %s420_s28 = int_to_ptr.vmem [resolvable:$true] %s419_s28 }
  0x11   :  { %504 = vmatpush3.msra.mxu0 %v45_v1  ;;  %539 = vmatpush3.msra.mxu1 %v140_v5  ;;  %v40_v9 = vld [vmem:[#allocation2 + $0x50] sm:$0xff]  ;;  %v137_v10 = vld [vmem:[#allocation2 + $0xe0] sm:$0xff]  ;;  %v39_v11 = vld [vmem:[#allocation2 + $0x48] sm:$0xff]  ;;  %s671_s29 = scalar_lea.vmem %s420_s28, 128  ;;  %p676_p6 = scmp.lt.s32.totalorder %s420_s28, %s420_s28 }
  0x12   :  { %505 = vmatprep.subr.mxu0 %v698_v0  ;;  %540 = vmatprep.subr.mxu1 %v698_v0  ;;  %v136_v12 = vld [vmem:[#allocation2 + $0xd8] sm:$0xff]  ;;  %v38_v13 = vld [vmem:[#allocation2 + $0x40] sm:$0xff]  ;;  %v135_v14 = vld [vmem:[#allocation2 + $0xd0] sm:$0xff]  ;;  %p672_p5 = scmp.ne.s32.totalorder %s420_s28, %s671_s29  ;;  %p677_p7 = scmp.lt.s32.totalorder %s671_s29, %s671_s29 }
  0x13   :  { %506 = vmatpush3.msra.mxu0 %v44_v2  ;;  %541 = vmatpush3.msra.mxu1 %v139_v7  ;;  %v37_v15 = vld [vmem:[#allocation2 + $0x38] sm:$0xff]  ;;  %v134_v16 = vld [vmem:[#allocation2 + $0xc8] sm:$0xff]  ;;  %v36_v17 = vld [vmem:[#allocation2 + $0x30] sm:$0xff] }
  0x14   :  { %507 = vmatprep.subr.mxu0 %v698_v0  ;;  %542 = vmatprep.subr.mxu1 %v698_v0  ;;  %v133_v18 = vld [vmem:[#allocation2 + $0xc0] sm:$0xff]  ;;  %v35_v19 = vld [vmem:[#allocation2 + $0x28] sm:$0xff]  ;;  %v132_v20 = vld [vmem:[#allocation2 + $0xb8] sm:$0xff]  ;;  %p678_p8 = por %p677_p7, %p676_p6 }
  0x15   :  { %508 = vmatpush3.msra.mxu0 %v43_v3  ;;  %543 = vmatpush3.msra.mxu1 %v138_v8  ;;  %v34_v21 = vld [vmem:[#allocation2 + $0x20] sm:$0xff]  ;;  %v131_v22 = vld [vmem:[#allocation2 + $0xb0] sm:$0xff]  ;;  %v33_v23 = vld [vmem:[#allocation2 + $0x18] sm:$0xff] }
  0x16   :  { %509 = vmatprep.subr.mxu0 %v698_v0  ;;  %544 = vmatprep.subr.mxu1 %v698_v0  ;;  %v130_v24 = vld [vmem:[#allocation2 + $0xa8] sm:$0xff]  ;;  %v32_v25 = vld [vmem:[#allocation2 + $0x10] sm:$0xff]  ;;  %v129_v26 = vld [vmem:[#allocation2 + $0xa0] sm:$0xff]  ;;  %p679_p9 = pnand %p678_p8, %p672_p5 }
  0x17   :  { %510 = vmatpush3.msra.mxu0 %v42_v4  ;;  %545 = vmatpush3.msra.mxu1 %v137_v10  ;;  %v31_v27 = vld [vmem:[#allocation2 + $0x8] sm:$0xff]  ;;  %v128_v28 = vld [vmem:[#allocation2 + $0x98] sm:$0xff]  ;;  %v30_v29 = vld [vmem:[#allocation2] sm:$0xff] }
  0x18   :  { %511 = vmatprep.subr.mxu0 %v698_v0  ;;  %546 = vmatprep.subr.mxu1 %v698_v0  ;;  %v29_v30 = vld [vmem:[%s814_s0] sm:$0xff]  ;;  %v127_v31 = vld [vmem:[#allocation2 + $0x90] sm:$0xff]  ;;  %v126_v32 = vld [vmem:[#allocation2 + $0x88] sm:$0xff] }
  0x19   :  { %512 = vmatpush3.msra.mxu0 %v41_v6  ;;  %547 = vmatpush3.msra.mxu1 %v136_v12  ;;  %v125_v33 = vld [vmem:[#allocation2 + $0x80] sm:$0xff]  ;;  %v236_v34 = vld [vmem:[#allocation2 + $0x178] sm:$0xff]  ;;  %v235_v35 = vld [vmem:[#allocation2 + $0x170] sm:$0xff] }
  0x1a   :  { %513 = vmatprep.subr.mxu0 %v698_v0  ;;  %548 = vmatprep.subr.mxu1 %v698_v0  ;;  %v234_v36 = vld [vmem:[#allocation2 + $0x168] sm:$0xff]  ;;  %v233_v37 = vld [vmem:[#allocation2 + $0x160] sm:$0xff]  ;;  %v232_v38 = vld [vmem:[#allocation2 + $0x158] sm:$0xff] }
  0x1b   :  { %514 = vmatpush3.msra.mxu0 %v40_v9  ;;  %549 = vmatpush3.msra.mxu1 %v135_v14  ;;  %v231_v39 = vld [vmem:[#allocation2 + $0x150] sm:$0xff]  ;;  %v230_v40 = vld [vmem:[#allocation2 + $0x148] sm:$0xff]  ;;  %v229_v41 = vld [vmem:[#allocation2 + $0x140] sm:$0xff] }
  0x1c   :  { %515 = vmatprep.subr.mxu0 %v698_v0  ;;  %550 = vmatprep.subr.mxu1 %v698_v0  ;;  %v228_v42 = vld [vmem:[#allocation2 + $0x138] sm:$0xff]  ;;  %v227_v43 = vld [vmem:[#allocation2 + $0x130] sm:$0xff]  ;;  %v226_v44 = vld [vmem:[#allocation2 + $0x128] sm:$0xff] }
  0x1d   :  { %516 = vmatpush3.msra.mxu0 %v39_v11  ;;  %551 = vmatpush3.msra.mxu1 %v134_v16  ;;  %v225_v45 = vld [vmem:[#allocation2 + $0x120] sm:$0xff]  ;;  %v224_v46 = vld [vmem:[#allocation2 + $0x118] sm:$0xff]  ;;  %v223_v52 = vld [vmem:[#allocation2 + $0x110] sm:$0xff] }
  0x1e   :  { %517 = vmatprep.subr.mxu0 %v698_v0  ;;  %552 = vmatprep.subr.mxu1 %v698_v0  ;;  %v428_v47 = vld [vmem:[%s816_s2] ss:$0 sm:$0xff]  ;;  %v222_v53 = vld [vmem:[#allocation2 + $0x108] sm:$0xff]  ;;  %v332_v55 = vld [vmem:[#allocation2 + $0x1f8] sm:$0xff] }
  0x1f   :  { %518 = vmatpush3.msra.mxu0 %v38_v13  ;;  %553 = vmatpush3.msra.mxu1 %v133_v18  ;;  %v221_v54 = vld [vmem:[#allocation2 + $0x100] sm:$0xff]  ;;  %v331_v56 = vld [vmem:[#allocation2 + $0x1f0] sm:$0xff]  ;;  %v330_v57 = vld [vmem:[#allocation2 + $0x1e8] sm:$0xff] }
  0x20   :  { %519 = vmatprep.subr.mxu0 %v698_v0  ;;  %554 = vmatprep.subr.mxu1 %v698_v0  ;;  %v329_v58 = vld [vmem:[#allocation2 + $0x1e0] sm:$0xff]  ;;  %v328_v59 = vld [vmem:[#allocation2 + $0x1d8] sm:$0xff]  ;;  %v327_v60 = vld [vmem:[#allocation2 + $0x1d0] sm:$0xff] }
  0x21   :  { %520 = vmatpush3.msra.mxu0 %v37_v15  ;;  %555 = vmatpush3.msra.mxu1 %v132_v20  ;;  %v326_v61 = vld [vmem:[#allocation2 + $0x1c8] sm:$0xff]  ;;  %v325_v62 = vld [vmem:[#allocation2 + $0x1c0] sm:$0xff]  ;;  %v324_v63 = vld [vmem:[#allocation2 + $0x1b8] sm:$0xff] }
  0x22   :  { %521 = vmatprep.subr.mxu0 %v698_v0  ;;  %556 = vmatprep.subr.mxu1 %v698_v0  ;;  %v323_v1 = vld [vmem:[#allocation2 + $0x1b0] sm:$0xff]  ;;  %v322_v2 = vld [vmem:[#allocation2 + $0x1a8] sm:$0xff]  ;;  %v321_v3 = vld [vmem:[#allocation2 + $0x1a0] sm:$0xff] }
  0x23   :  { %522 = vmatpush3.msra.mxu0 %v36_v17  ;;  %557 = vmatpush3.msra.mxu1 %v131_v22  ;;  %v320_v4 = vld [vmem:[#allocation2 + $0x198] sm:$0xff]  ;;  %v430_v5 = vld [vmem:[%s816_s2 + $0x1] ss:$0 sm:$0xff]  ;;  %v319_v10 = vld [vmem:[#allocation2 + $0x190] sm:$0xff] }
  0x24   :  { %523 = vmatprep.subr.mxu0 %v698_v0  ;;  %558 = vmatprep.subr.mxu1 %v698_v0  ;;  %v318_v11 = vld [vmem:[#allocation2 + $0x188] sm:$0xff]  ;;  %v317_v12 = vld [vmem:[#allocation2 + $0x180] sm:$0xff] }
  0x25   :  { %524 = vmatpush3.msra.mxu0 %v35_v19  ;;  %559 = vmatpush3.msra.mxu1 %v130_v24  ;;  %v432_v13 = vld [vmem:[%s816_s2 + $0x2] ss:$0 sm:$0xff]  ;;  %v434_v18 = vld [vmem:[%s816_s2 + $0x3] ss:$0 sm:$0xff] }
  0x26   :  { %525 = vmatprep.subr.mxu0 %v698_v0  ;;  %560 = vmatprep.subr.mxu1 %v698_v0 }
  0x27   :  { %526 = vmatpush3.msra.mxu0 %v34_v21  ;;  %561 = vmatpush3.msra.mxu1 %v129_v26 }
  0x28   :  { %527 = vmatprep.subr.mxu0 %v698_v0  ;;  %562 = vmatprep.subr.mxu1 %v698_v0 }
  0x29   :  { %528 = vmatpush3.msra.mxu0 %v33_v23  ;;  %563 = vmatpush3.msra.mxu1 %v128_v28 }
  0x2a   :  { %529 = vmatprep.subr.mxu0 %v698_v0  ;;  %564 = vmatprep.subr.mxu1 %v698_v0 }
  0x2b   :  { %530 = vmatpush3.msra.mxu0 %v32_v25  ;;  %565 = vmatpush3.msra.mxu1 %v127_v31 }
  0x2c   :  { %531 = vmatprep.subr.mxu0 %v698_v0  ;;  %566 = vmatprep.subr.mxu1 %v698_v0 }
  0x2d   :  { %532 = vmatpush3.msra.mxu0 %v31_v27  ;;  %567 = vmatpush3.msra.mxu1 %v126_v32 }
  0x2e   :  { %533 = vmatprep.subr.mxu0 %v698_v0  ;;  %568 = vmatprep.subr.mxu1 %v698_v0 }
  0x2f   :  { %534 = vmatpush3.msra.mxu0 %v30_v29  ;;  %569 = vmatpush3.msra.mxu1 %v125_v33 }
  0x30   :  { %536 = vmatmul.mubr.f32.vlgmr.msra.gmra.mxu0 %v29_v30  ;;  %573 = vmatprep.subr.mxu0 %v698_v0 }
  0x31   :  { %605 = vmatprep.mubr.msk.f32.mxu0 %vm699_vm0, %v698_v0  ;;  %608 = vmatprep.subr.mxu1 %v698_v0 }
  0x32   :  { %574 = vmatpush3.msra.mxu0 %v236_v34 }
  0x33   :  { %575 = vmatprep.subr.mxu0 %v698_v0 }
  0x34   :  { %576 = vmatpush3.msra.mxu0 %v235_v35 }
  0x35   :  { %577 = vmatprep.subr.mxu0 %v698_v0 }
  0x36   :  { %578 = vmatpush3.msra.mxu0 %v234_v36 }
  0x37   :  { %579 = vmatprep.subr.mxu0 %v698_v0 }
  0x38   :  { %580 = vmatpush3.msra.mxu0 %v233_v37 }
  0x39   :  { %581 = vmatprep.subr.mxu0 %v698_v0 }
  0x3a   :  { %582 = vmatpush3.msra.mxu0 %v232_v38 }
  0x3b   :  { %583 = vmatprep.subr.mxu0 %v698_v0 }
  0x3c   :  { %584 = vmatpush3.msra.mxu0 %v231_v39 }
  0x3d   :  { %585 = vmatprep.subr.mxu0 %v698_v0 }
  0x3e   :  { %586 = vmatpush3.msra.mxu0 %v230_v40 }
  0x3f   :  { %587 = vmatprep.subr.mxu0 %v698_v0 }
  0x40   :  { %588 = vmatpush3.msra.mxu0 %v229_v41 }
  0x41   :  { %589 = vmatprep.subr.mxu0 %v698_v0 }
  0x42   :  { %590 = vmatpush3.msra.mxu0 %v228_v42 }
  0x43   :  { %591 = vmatprep.subr.mxu0 %v698_v0 }
  0x44   :  { %592 = vmatpush3.msra.mxu0 %v227_v43 }
  0x45   :  { %593 = vmatprep.subr.mxu0 %v698_v0 }
  0x46   :  { %594 = vmatpush3.msra.mxu0 %v226_v44 }
  0x47   :  { %595 = vmatprep.subr.mxu0 %v698_v0 }
  0x48   :  { %596 = vmatpush3.msra.mxu0 %v225_v45 }
  0x49   :  { %597 = vmatprep.subr.mxu0 %v698_v0 }
  0x4a   :  { %598 = vmatpush3.msra.mxu0 %v224_v46 }
  0x4b   :  { %599 = vmatprep.subr.mxu0 %v698_v0 }
  0x4c   :  { %600 = vmatpush3.msra.mxu0 %v223_v52 }
  0x4d   :  { %601 = vmatprep.subr.mxu0 %v698_v0 }
  0x4e   :  { %602 = vmatpush3.msra.mxu0 %v222_v53 }
  0x4f   :  { %603 = vmatprep.subr.mxu0 %v698_v0 }
  0x50   :  { %604 = vmatpush3.msra.mxu0 %v221_v54 }
  0xf0   :  { %v119_v48 = vpop.f32.mrf.mxu0 }
  0xf1   :  { %v120_v49 = vadd.f32 %v428_v47, %v119_v48 }
  0xf2   :  { %v537_v50 = vpop.f32.mrf.mxu0 }
  0xf3   :  { %v123_v51 = vmax.f32 %v120_v49, 0.0 }
  0xf5   :  { %571 = vmatmul.mubr.f32.vlgmr.msra.gmra.mxu1 %v123_v51 }
  0xf6   :  { %640 = vmatprep.mubr.msk.f32.mxu1 %vm699_vm0, %v698_v0  ;;  %609 = vmatpush3.msra.mxu1 %v332_v55 }
  0xf7   :  { %610 = vmatprep.subr.mxu1 %v698_v0 }
  0xf8   :  { %611 = vmatpush3.msra.mxu1 %v331_v56 }
  0xf9   :  { %612 = vmatprep.subr.mxu1 %v698_v0 }
  0xfa   :  { %613 = vmatpush3.msra.mxu1 %v330_v57 }
  0xfb   :  { %614 = vmatprep.subr.mxu1 %v698_v0 }
  0xfc   :  { %615 = vmatpush3.msra.mxu1 %v329_v58 }
  0xfd   :  { %616 = vmatprep.subr.mxu1 %v698_v0 }
  0xfe   :  { %617 = vmatpush3.msra.mxu1 %v328_v59 }
  0xff   :  { %618 = vmatprep.subr.mxu1 %v698_v0 }
 0x100   :  { %619 = vmatpush3.msra.mxu1 %v327_v60 }
 0x101   :  { %620 = vmatprep.subr.mxu1 %v698_v0 }
 0x102   :  { %621 = vmatpush3.msra.mxu1 %v326_v61 }
 0x103   :  { %622 = vmatprep.subr.mxu1 %v698_v0 }
 0x104   :  { %623 = vmatpush3.msra.mxu1 %v325_v62 }
 0x105   :  { %624 = vmatprep.subr.mxu1 %v698_v0 }
 0x106   :  { %625 = vmatpush3.msra.mxu1 %v324_v63 }
 0x107   :  { %626 = vmatprep.subr.mxu1 %v698_v0 }
 0x108   :  { %627 = vmatpush3.msra.mxu1 %v323_v1 }
 0x109   :  { %628 = vmatprep.subr.mxu1 %v698_v0 }
 0x10a   :  { %629 = vmatpush3.msra.mxu1 %v322_v2 }
 0x10b   :  { %630 = vmatprep.subr.mxu1 %v698_v0 }
 0x10c   :  { %631 = vmatpush3.msra.mxu1 %v321_v3 }
 0x10d   :  { %632 = vmatprep.subr.mxu1 %v698_v0 }
 0x10e   :  { %633 = vmatpush3.msra.mxu1 %v320_v4 }
 0x10f   :  { %634 = vmatprep.subr.mxu1 %v698_v0 }
 0x110   :  { %635 = vmatpush3.msra.mxu1 %v319_v10 }
 0x111   :  { %636 = vmatprep.subr.mxu1 %v698_v0 }
 0x112   :  { %637 = vmatpush3.msra.mxu1 %v318_v11 }
 0x113   :  { %638 = vmatprep.subr.mxu1 %v698_v0 }
 0x114   :  { %639 = vmatpush3.msra.mxu1 %v317_v12 }
 0x1b5   :  { %v215_v6 = vpop.f32.mrf.mxu1 }
 0x1b6   :  { %v216_v7 = vadd.f32 %v430_v5, %v215_v6 }
 0x1b7   :  { %v572_v8 = vpop.f32.mrf.mxu1 }
 0x1b8   :  { %v219_v9 = vmax.f32 %v216_v7, 0.0 }
 0x1ba   :  { %606 = vmatmul.mubr.f32.vlgmr.msra.gmra.mxu0 %v219_v9 }
 0x27a   :  { %v311_v14 = vpop.f32.mrf.mxu0 }
 0x27b   :  { %v312_v15 = vadd.f32 %v432_v13, %v311_v14 }
 0x27c   :  { %v607_v16 = vpop.f32.mrf.mxu0 }
 0x27d   :  { %v315_v17 = vmax.f32 %v312_v15, 0.0 }
 0x27f   :  { %641 = vmatmul.mubr.f32.vlgmr.msra.gmra.mxu1 %v315_v17 }
 0x33f   :  { %v407_v19 = vpop.f32.mrf.mxu1 }
 0x340   :  { %v408_v20 = vadd.f32 %v434_v18, %v407_v19 }
 0x341   :  { %v642_v21 = vpop.f32.mrf.mxu1 }
 0x342   :  { %649 = vtanh.f32 %v408_v20 }
 0x34f   :  { %v650_v0 = vpop.eup %649 }
 0x350   :  { %412 = vst [vmem:[#allocation5] sm:$0xff] %v650_v0 }
 0x351   :  { %682 = shalt.err (!%p679_p9)
}
 0x352   :  { %422 = dma.vmem_to_hbm [thread:$0]  %s420_s28, 128, %s817_s3, [#allocation4]  }
 0x353   :  { %693 = dma.done.wait [#allocation4], 128  }
 0x354   :  { %694 = vsyncadd [#allocation4], 4294967168 }
 0x355   :  { %426 = vsyncpa [#allocation3], 1 }
 0x356   :  { %427 = vsyncpa [#allocation4], 1 }

</bundles_post_ra>
